<compile_context>
chip_gen: v7x
topology: tpu7x:2x2x1
jax: 0.10.0
libtpu: 0.0.40
codegen_flags: <defaults>
</compile_context>

<pallas_src>
import math
import functools

import jax
import jax.numpy as jnp
from jax import lax
from jax.experimental import pallas as pl
from jax.experimental.pallas import tpu as pltpu


def _softmax_lastdim(x):
    """Row softmax; divide via EUP reciprocal instead of a full VALU divide pass."""
    m = jnp.max(x, axis=-1, keepdims=True)
    e = jnp.exp(x - m)
    s = jnp.sum(e, axis=-1, keepdims=True)
    return e * pl.reciprocal(s, approx=True)


def hgat_kernel(x_ref, adj_ref, adjT_ref, wcat_ref, w3_ref, wc_ref,
                node_ref, edge_ref, *, inv_temp, dout_p):
    x = x_ref[0]                                    # (N2, Din) f32
    adj = adj_ref[0].astype(jnp.float32)            # (N1, N2)  int8 -> f32
    adjT = adjT_ref[0].astype(jnp.float32)          # (N2, N1)
    wcat = wcat_ref[...]                            # (Din, 2*Dp)  [weight | weight2]
    w3 = w3_ref[...]                                # (Dp, Dp)
    wc = wc_ref[...]                                # (1, Dp)

    n1 = adj.shape[0]
    neg_big = jnp.float32(-1000000000.0)

    # Fused projections: one (N2, Din) x (Din, 2*Dp) MXU matmul instead of two.
    xw = jnp.dot(x, wcat, preferred_element_type=jnp.float32)     # (N2, 2*Dp)
    xv = xw[:, :dout_p]                  # x @ weight   (values; transfer=True, bias=False)
    x_4att = xw[:, dout_p:]              # x @ weight2  (keys)

    # ---- attention 1: query = word_context, identical for every hyperedge ----
    # Pre-mask scores are a single (1, N2) row; no (N1,Dp)x(Dp,N2) matmul needed.
    wc_scaled = wc * inv_temp                                     # fold 1/temperature into 1xDp operand
    s1 = lax.dot_general(wc_scaled, x_4att, (((1,), (1,)), ((), ())),
                         preferred_element_type=jnp.float32)      # (1, N2)
    attn1 = jnp.broadcast_to(s1, (n1, s1.shape[1]))               # cheap sublane broadcast
    attn1 = jnp.where(adj == 0.0, neg_big, attn1)
    p1 = _softmax_lastdim(attn1)                                  # (N1, N2)
    edge = jnp.dot(p1, xv, preferred_element_type=jnp.float32)    # (N1, Dp)

    # ---- attention 2: nodes attend over hyperedges ----
    # Fold 1/temperature into the smaller (N1, Dp) operand; contract last dims (no .T).
    edge_4att = jnp.dot(edge, w3, preferred_element_type=jnp.float32) * inv_temp
    s2 = lax.dot_general(x_4att, edge_4att, (((1,), (1,)), ((), ())),
                         preferred_element_type=jnp.float32)      # (N2, N1)
    attn2 = jnp.where(adjT == 0.0, neg_big, s2)
    p2 = _softmax_lastdim(attn2)                                  # (N2, N1)
    node = jnp.dot(p2, edge, preferred_element_type=jnp.float32)  # (N2, Dp)

    # concat=True -> ReLU on both outputs.
    node_ref[0] = jnp.maximum(node, 0.0).astype(node_ref.dtype)
    edge_ref[0] = jnp.maximum(edge, 0.0).astype(edge_ref.dtype)


def hypergraph_attention(x, adj, weight, weight2, weight3, word_context):
    B, N2, Din = x.shape
    _, N1, _ = adj.shape
    Dout = weight2.shape[1]
    temperature = float(Dout) ** 0.5
    inv_temp = 1.0 / temperature

    # Lane-dense outputs: pad the feature dim to a multiple of 128.
    Dp = ((Dout + 127) // 128) * 128

    def pad_cols(w):
        return jnp.pad(w.astype(jnp.float32), ((0, 0), (0, Dp - Dout)))

    weight_p = pad_cols(weight)
    weight2_p = pad_cols(weight2)
    w3_p = jnp.pad(weight3.astype(jnp.float32), ((0, Dp - Dout), (0, Dp - Dout)))
    wc_p = pad_cols(word_context.reshape(1, Dout))
    wcat = jnp.concatenate([weight_p, weight2_p], axis=1)          # (Din, 2*Dp)

    # adj as int8 incidence mask (4x less HBM/VMEM traffic than f32); pre-transposed
    # copy so the kernel never performs an (N1, N2) XLU transpose.
    adj_i8 = (adj != 0).astype(jnp.int8)
    adjT_i8 = jnp.transpose(adj_i8, (0, 2, 1))

    # Rough per-step VMEM budget: double-buffered blocks + resident weights + temporaries.
    per_step = (
        2 * N2 * Din * 4                          # x (double-buffered)
        + 2 * (N1 * N2 + N2 * N1) * 1             # adj + adjT (int8, double-buffered)
        + 2 * (N2 * Dp + N1 * Dp) * 4             # outputs (double-buffered)
        + (Din * 2 * Dp + Dp * Dp + Dp) * 4       # weights (resident)
        + (N2 * 2 * Dp + 2 * N1 * N2 + 2 * N1 * Dp + N2 * Dp) * 4  # score/value temporaries
    )
    vmem_limit = int(min(max(2 * per_step, 32 * 1024 * 1024), 64 * 1024 * 1024))

    kernel = functools.partial(hgat_kernel, inv_temp=inv_temp, dout_p=Dp)

    node_p, edge_p = pl.pallas_call(
        kernel,
        out_shape=(
            jax.ShapeDtypeStruct((B, N2, Dp), jnp.float32),
            jax.ShapeDtypeStruct((B, N1, Dp), jnp.float32),
        ),
        grid_spec=pltpu.PrefetchScalarGridSpec(
            num_scalar_prefetch=0,
            grid=(B,),
            in_specs=[
                pl.BlockSpec((1, N2, Din), lambda b: (b, 0, 0)),
                pl.BlockSpec((1, N1, N2), lambda b: (b, 0, 0)),
                pl.BlockSpec((1, N2, N1), lambda b: (b, 0, 0)),
                pl.BlockSpec((Din, 2 * Dp), lambda b: (0, 0)),
                pl.BlockSpec((Dp, Dp), lambda b: (0, 0)),
                pl.BlockSpec((1, Dp), lambda b: (0, 0)),
            ],
            out_specs=[
                pl.BlockSpec((1, N2, Dp), lambda b: (b, 0, 0)),
                pl.BlockSpec((1, N1, Dp), lambda b: (b, 0, 0)),
            ],
        ),
        compiler_params=pltpu.CompilerParams(
            dimension_semantics=("parallel",),
            vmem_limit_bytes=vmem_limit,
        ),
    )(x.astype(jnp.float32), adj_i8, adjT_i8, wcat, w3_p, wc_p)

    # Slice padded feature columns off outside the kernel (lane-aligned slice).
    return node_p[:, :, :Dout], edge_p[:, :, :Dout]


def reference_forward(x, adj, weight, weight2, weight3, word_context):
    """Pure-JAX reference mirroring the PyTorch module (eval mode)."""
    Dout = weight2.shape[1]
    temp = float(Dout) ** 0.5
    x_4att = x @ weight2
    xv = x @ weight
    B, N1, N2 = adj.shape
    q1 = jnp.broadcast_to(word_context.reshape(1, 1, Dout), (B, N1, Dout))
    attn1 = jnp.einsum("bnd,bmd->bnm", q1 / temp, x_4att)
    attn1 = jnp.where(adj == 0, -1000000000.0, attn1)
    attn1 = jax.nn.softmax(attn1, axis=-1)
    edge = jnp.einsum("bnm,bmd->bnd", attn1, xv)
    edge_4att = edge @ weight3
    attn2 = jnp.einsum("bmd,bnd->bmn", x_4att / temp, edge_4att)
    attn2 = jnp.where(jnp.transpose(adj, (0, 2, 1)) == 0, -1000000000.0, attn2)
    attn2 = jax.nn.softmax(attn2, axis=-1)
    node = jnp.einsum("bmn,bnd->bmd", attn2, edge)
    return jax.nn.relu(node), jax.nn.relu(edge)


if __name__ == "__main__":
    B, N1, N2 = 2, 8, 16       # batch, hyperedges, nodes
    Din, Dout = 8, 32

    key = jax.random.PRNGKey(0)
    kx, kadj, kw, kw2, kw3, kwc = jax.random.split(key, 6)

    x = jax.random.normal(kx, (B, N2, Din), dtype=jnp.float32)
    adj = (jax.random.uniform(kadj, (B, N1, N2)) > 0.5).astype(jnp.float32)

    # deterministic parameter init matching reset_parameters(): U(-stdv, stdv)
    stdv = 1.0 / math.sqrt(Dout)
    weight = jax.random.uniform(kw, (Din, Dout), minval=-stdv, maxval=stdv, dtype=jnp.float32)
    weight2 = jax.random.uniform(kw2, (Din, Dout), minval=-stdv, maxval=stdv, dtype=jnp.float32)
    weight3 = jax.random.uniform(kw3, (Dout, Dout), minval=-stdv, maxval=stdv, dtype=jnp.float32)
    word_context = jax.random.uniform(kwc, (1, Dout), minval=-stdv, maxval=stdv, dtype=jnp.float32)

    node, edge = hypergraph_attention(x, adj, weight, weight2, weight3, word_context)
    jax.block_until_ready((node, edge))

    node_ref, edge_ref = reference_forward(x, adj, weight, weight2, weight3, word_context)
    assert node.shape == node_ref.shape and edge.shape == edge_ref.shape
    assert jnp.allclose(node, node_ref, atol=2e-3, rtol=2e-3), "node mismatch"
    assert jnp.allclose(edge, edge_ref, atol=2e-3, rtol=2e-3), "edge mismatch"

    print("KERNEL_OK")
</pallas_src>

<mosaic_0001>
module attributes {stable_mosaic.version = 11 : i64} {
  func.func @hgat_kernel(%arg0: i32, %arg1: memref<1x16x8xf32, #tpu.memory_space<vmem>>, %arg2: memref<1x8x16xi8, #tpu.memory_space<vmem>>, %arg3: memref<1x16x8xi8, #tpu.memory_space<vmem>>, %arg4: memref<8x256xf32, #tpu.memory_space<vmem>>, %arg5: memref<128x128xf32, #tpu.memory_space<vmem>>, %arg6: memref<1x128xf32, #tpu.memory_space<vmem>>, %arg7: memref<1x16x128xf32, #tpu.memory_space<vmem>>, %arg8: memref<1x8x128xf32, #tpu.memory_space<vmem>>) attributes {dimension_semantics = [#tpu.dimension_semantics<parallel>], iteration_bounds = array<i64: 2>, scalar_prefetch = 0 : i64, scratch_operands = 0 : i64, tpu.core_type = #tpu.core_type<tc>, window_params = [{transform_indices = @transform_0, window_bounds = array<i64: 1, 16, 8>}, {transform_indices = @transform_1, window_bounds = array<i64: 1, 8, 16>}, {transform_indices = @transform_2, window_bounds = array<i64: 1, 16, 8>}, {pipeline_mode = #tpu.pipeline_mode<synchronous>, transform_indices = @transform_3, window_bounds = array<i64: 8, 256>}, {pipeline_mode = #tpu.pipeline_mode<synchronous>, transform_indices = @transform_4, window_bounds = array<i64: 128, 128>}, {pipeline_mode = #tpu.pipeline_mode<synchronous>, transform_indices = @transform_5, window_bounds = array<i64: 1, 128>}, {transform_indices = @transform_6, window_bounds = array<i64: 1, 16, 128>}, {transform_indices = @transform_7, window_bounds = array<i64: 1, 8, 128>}]} {
    %c0 = arith.constant 0 : index
    %c0_0 = arith.constant 0 : index
    %c0_1 = arith.constant 0 : index
    %0 = vector.load %arg1[%c0, %c0_0, %c0_1] : memref<1x16x8xf32, #tpu.memory_space<vmem>>, vector<1x16x8xf32>
    %1 = vector.shape_cast %0 : vector<1x16x8xf32> to vector<16x8xf32>
    %c0_2 = arith.constant 0 : index
    %c0_3 = arith.constant 0 : index
    %c0_4 = arith.constant 0 : index
    %2 = vector.load %arg2[%c0_2, %c0_3, %c0_4] : memref<1x8x16xi8, #tpu.memory_space<vmem>>, vector<1x8x16xi8>
    %3 = vector.shape_cast %2 : vector<1x8x16xi8> to vector<8x16xi8>
    %4 = arith.sitofp %3 : vector<8x16xi8> to vector<8x16xf32>
    %c0_5 = arith.constant 0 : index
    %c0_6 = arith.constant 0 : index
    %c0_7 = arith.constant 0 : index
    %5 = vector.load %arg3[%c0_5, %c0_6, %c0_7] : memref<1x16x8xi8, #tpu.memory_space<vmem>>, vector<1x16x8xi8>
    %6 = vector.shape_cast %5 : vector<1x16x8xi8> to vector<16x8xi8>
    %7 = arith.sitofp %6 : vector<16x8xi8> to vector<16x8xf32>
    %c0_8 = arith.constant 0 : index
    %c0_9 = arith.constant 0 : index
    %8 = vector.load %arg4[%c0_8, %c0_9] : memref<8x256xf32, #tpu.memory_space<vmem>>, vector<8x256xf32>
    %c0_10 = arith.constant 0 : index
    %c0_11 = arith.constant 0 : index
    %9 = vector.load %arg5[%c0_10, %c0_11] : memref<128x128xf32, #tpu.memory_space<vmem>>, vector<128x128xf32>
    %c0_12 = arith.constant 0 : index
    %c0_13 = arith.constant 0 : index
    %10 = vector.load %arg6[%c0_12, %c0_13] : memref<1x128xf32, #tpu.memory_space<vmem>>, vector<1x128xf32>
    %cst = arith.constant dense<0.000000e+00> : vector<16x256xf32>
    %11 = tpu.matmul %1, %8, %cst {dimension_numbers = #tpu.dot_dimension_numbers<[1], [0], [0], [1], [0, 0, 1, 1], [], []>} : vector<16x8xf32>, vector<8x256xf32>, vector<16x256xf32> -> vector<16x256xf32>
    %12 = vector.extract_strided_slice %11 {offsets = [0, 0], sizes = [16, 128], strides = [1, 1]} : vector<16x256xf32> to vector<16x128xf32>
    %13 = vector.extract_strided_slice %11 {offsets = [0, 128], sizes = [16, 128], strides = [1, 1]} : vector<16x256xf32> to vector<16x128xf32>
    %cst_14 = arith.constant 0.176776692 : f32
    %14 = vector.broadcast %cst_14 : f32 to vector<1x128xf32>
    %15 = arith.mulf %10, %14 : vector<1x128xf32>
    %cst_15 = arith.constant dense<0.000000e+00> : vector<1x16xf32>
    %16 = tpu.matmul %15, %13, %cst_15 {dimension_numbers = #tpu.dot_dimension_numbers<[1], [1], [0], [0], [0, 0, 1, 0], [], []>} : vector<1x128xf32>, vector<16x128xf32>, vector<1x16xf32> -> vector<1x16xf32>
    %17 = vector.shape_cast %16 : vector<1x16xf32> to vector<1x16xf32>
    %18 = vector.broadcast %17 : vector<1x16xf32> to vector<8x16xf32>
    %cst_16 = arith.constant 0.000000e+00 : f32
    %19 = vector.broadcast %cst_16 : f32 to vector<8x16xf32>
    %20 = arith.cmpf oeq, %4, %19 : vector<8x16xf32>
    %cst_17 = arith.constant -1.000000e+09 : f32
    %21 = vector.broadcast %cst_17 : f32 to vector<8x16xf32>
    %22 = arith.select %20, %21, %18 : vector<8x16xi1>, vector<8x16xf32>
    %cst_18 = arith.constant dense<0xFF800000> : vector<8xf32>
    %23 = vector.multi_reduction <maximumf>, %22, %cst_18 [1] : vector<8x16xf32> to vector<8xf32>
    %24 = vector.shape_cast %23 : vector<8xf32> to vector<8x1xf32>
    %25 = vector.broadcast %24 : vector<8x1xf32> to vector<8x16xf32>
    %26 = arith.subf %22, %25 : vector<8x16xf32>
    %27 = math.exp %26 : vector<8x16xf32>
    %cst_19 = arith.constant dense<0.000000e+00> : vector<8xf32>
    %28 = vector.multi_reduction <add>, %27, %cst_19 [1] : vector<8x16xf32> to vector<8xf32>
    %29 = vector.shape_cast %28 : vector<8xf32> to vector<8x1xf32>
    %30 = tpu.reciprocal %29 {approx = true} : vector<8x1xf32> -> vector<8x1xf32>
    %31 = vector.broadcast %30 : vector<8x1xf32> to vector<8x16xf32>
    %32 = arith.mulf %27, %31 : vector<8x16xf32>
    %cst_20 = arith.constant dense<0.000000e+00> : vector<8x128xf32>
    %33 = tpu.matmul %32, %12, %cst_20 {dimension_numbers = #tpu.dot_dimension_numbers<[1], [0], [0], [1], [0, 0, 1, 1], [], []>} : vector<8x16xf32>, vector<16x128xf32>, vector<8x128xf32> -> vector<8x128xf32>
    %cst_21 = arith.constant dense<0.000000e+00> : vector<8x128xf32>
    %34 = tpu.matmul %33, %9, %cst_21 {dimension_numbers = #tpu.dot_dimension_numbers<[1], [0], [0], [1], [0, 0, 1, 1], [], []>} : vector<8x128xf32>, vector<128x128xf32>, vector<8x128xf32> -> vector<8x128xf32>
    %cst_22 = arith.constant 0.176776692 : f32
    %35 = vector.broadcast %cst_22 : f32 to vector<8x128xf32>
    %36 = arith.mulf %34, %35 : vector<8x128xf32>
    %cst_23 = arith.constant dense<0.000000e+00> : vector<16x8xf32>
    %37 = tpu.matmul %13, %36, %cst_23 {dimension_numbers = #tpu.dot_dimension_numbers<[1], [1], [0], [0], [0, 0, 1, 0], [], []>} : vector<16x128xf32>, vector<8x128xf32>, vector<16x8xf32> -> vector<16x8xf32>
    %cst_24 = arith.constant 0.000000e+00 : f32
    %38 = vector.broadcast %cst_24 : f32 to vector<16x8xf32>
    %39 = arith.cmpf oeq, %7, %38 : vector<16x8xf32>
    %cst_25 = arith.constant -1.000000e+09 : f32
    %40 = vector.broadcast %cst_25 : f32 to vector<16x8xf32>
    %41 = arith.select %39, %40, %37 : vector<16x8xi1>, vector<16x8xf32>
    %cst_26 = arith.constant dense<0xFF800000> : vector<16xf32>
    %42 = vector.multi_reduction <maximumf>, %41, %cst_26 [1] : vector<16x8xf32> to vector<16xf32>
    %43 = vector.shape_cast %42 : vector<16xf32> to vector<16x1xf32>
    %44 = vector.broadcast %43 : vector<16x1xf32> to vector<16x8xf32>
    %45 = arith.subf %41, %44 : vector<16x8xf32>
    %46 = math.exp %45 : vector<16x8xf32>
    %cst_27 = arith.constant dense<0.000000e+00> : vector<16xf32>
    %47 = vector.multi_reduction <add>, %46, %cst_27 [1] : vector<16x8xf32> to vector<16xf32>
    %48 = vector.shape_cast %47 : vector<16xf32> to vector<16x1xf32>
    %49 = tpu.reciprocal %48 {approx = true} : vector<16x1xf32> -> vector<16x1xf32>
    %50 = vector.broadcast %49 : vector<16x1xf32> to vector<16x8xf32>
    %51 = arith.mulf %46, %50 : vector<16x8xf32>
    %cst_28 = arith.constant dense<0.000000e+00> : vector<16x128xf32>
    %52 = tpu.matmul %51, %33, %cst_28 {dimension_numbers = #tpu.dot_dimension_numbers<[1], [0], [0], [1], [0, 0, 1, 1], [], []>} : vector<16x8xf32>, vector<8x128xf32>, vector<16x128xf32> -> vector<16x128xf32>
    %cst_29 = arith.constant 0.000000e+00 : f32
    %53 = vector.broadcast %cst_29 : f32 to vector<16x128xf32>
    %54 = arith.maximumf %52, %53 : vector<16x128xf32>
    %c0_30 = arith.constant 0 : index
    %c0_31 = arith.constant 0 : index
    %c0_32 = arith.constant 0 : index
    %55 = vector.load %arg7[%c0_30, %c0_31, %c0_32] : memref<1x16x128xf32, #tpu.memory_space<vmem>>, vector<1x16x128xf32>
    %56 = vector.shape_cast %55 : vector<1x16x128xf32> to vector<16x128xf32>
    %57 = vector.shape_cast %54 : vector<16x128xf32> to vector<1x16x128xf32>
    tpu.vector_store %arg7[%c0_30, %c0_31, %c0_32], %57 {strides = array<i32>} : memref<1x16x128xf32, #tpu.memory_space<vmem>>, vector<1x16x128xf32>,
    %cst_33 = arith.constant 0.000000e+00 : f32
    %58 = vector.broadcast %cst_33 : f32 to vector<8x128xf32>
    %59 = arith.maximumf %33, %58 : vector<8x128xf32>
    %c0_34 = arith.constant 0 : index
    %c0_35 = arith.constant 0 : index
    %c0_36 = arith.constant 0 : index
    %60 = vector.load %arg8[%c0_34, %c0_35, %c0_36] : memref<1x8x128xf32, #tpu.memory_space<vmem>>, vector<1x8x128xf32>
    %61 = vector.shape_cast %60 : vector<1x8x128xf32> to vector<8x128xf32>
    %62 = vector.shape_cast %59 : vector<8x128xf32> to vector<1x8x128xf32>
    tpu.vector_store %arg8[%c0_34, %c0_35, %c0_36], %62 {strides = array<i32>} : memref<1x8x128xf32, #tpu.memory_space<vmem>>, vector<1x8x128xf32>,
    return
  }
  func.func @transform_0(%arg0: i32) -> (i32, i32, i32) {
    %c0_i32 = arith.constant 0 : i32
    %c0_i32_0 = arith.constant 0 : i32
    %c0_i32_1 = arith.constant 0 : i32
    return %arg0, %c0_i32, %c0_i32_0 : i32, i32, i32
  }
  func.func @transform_1(%arg0: i32) -> (i32, i32, i32) {
    %c0_i32 = arith.constant 0 : i32
    %c0_i32_0 = arith.constant 0 : i32
    %c0_i32_1 = arith.constant 0 : i32
    return %arg0, %c0_i32, %c0_i32_0 : i32, i32, i32
  }
  func.func @transform_2(%arg0: i32) -> (i32, i32, i32) {
    %c0_i32 = arith.constant 0 : i32
    %c0_i32_0 = arith.constant 0 : i32
    %c0_i32_1 = arith.constant 0 : i32
    return %arg0, %c0_i32, %c0_i32_0 : i32, i32, i32
  }
  func.func @transform_3(%arg0: i32) -> (i32, i32) {
    %c0_i32 = arith.constant 0 : i32
    %c0_i32_0 = arith.constant 0 : i32
    %c0_i32_1 = arith.constant 0 : i32
    return %c0_i32, %c0_i32_0 : i32, i32
  }
  func.func @transform_4(%arg0: i32) -> (i32, i32) {
    %c0_i32 = arith.constant 0 : i32
    %c0_i32_0 = arith.constant 0 : i32
    %c0_i32_1 = arith.constant 0 : i32
    return %c0_i32, %c0_i32_0 : i32, i32
  }
  func.func @transform_5(%arg0: i32) -> (i32, i32) {
    %c0_i32 = arith.constant 0 : i32
    %c0_i32_0 = arith.constant 0 : i32
    %c0_i32_1 = arith.constant 0 : i32
    return %c0_i32, %c0_i32_0 : i32, i32
  }
  func.func @transform_6(%arg0: i32) -> (i32, i32, i32) {
    %c0_i32 = arith.constant 0 : i32
    %c0_i32_0 = arith.constant 0 : i32
    %c0_i32_1 = arith.constant 0 : i32
    return %arg0, %c0_i32, %c0_i32_0 : i32, i32, i32
  }
  func.func @transform_7(%arg0: i32) -> (i32, i32, i32) {
    %c0_i32 = arith.constant 0 : i32
    %c0_i32_0 = arith.constant 0 : i32
    %c0_i32_1 = arith.constant 0 : i32
    return %arg0, %c0_i32, %c0_i32_0 : i32, i32, i32
  }
}

</mosaic_0001>

<bundles_post_ra>
// kernel: tpu_custom_call.1
= control target key start
LH: loop header
LB: loop body
LE: loop exit
PB: predicated region body
PF: predicated region fallthrough
CT: control target
= control target key end

     0   :  { %13 = vsyncpa [#allocation3], 0  ;;  %s1658_s0 = inlined_call_operand.vmem [shape: f32[2,16,8], index: 0, kind: input, shape index: {}]   ;;  %s1659_s1 = inlined_call_operand.vmem [shape: s8[2,8,16], index: 1, kind: input, shape index: {}]   ;;  %s1660_s2 = inlined_call_operand.vmem [shape: s8[2,16,8], index: 2, kind: input, shape index: {}]   ;;  %s1661_s3 = inlined_call_operand.vmem [shape: f32[8,256], index: 3, kind: input, shape index: {}]   ;;  %s1662_s4 = inlined_call_operand.hbm [shape: f32[128,128], index: 4, kind: input, shape index: {}]   ;;  %s1663_s5 = inlined_call_operand.vmem [shape: f32[1,128], index: 5, kind: input, shape index: {}]   ;;  %s1664_s6 = inlined_call_operand.hbm [shape: f32[2,16,128], index: 6, kind: output, shape index: {0}]   ;;  %s1665_s7 = inlined_call_operand.hbm [shape: f32[2,8,128], index: 7, kind: output, shape index: {1}]  }
   0x1   :  { %14 = vsyncpa [#allocation4], 0 }
   0x2   :  { %16 = vsyncpa [#allocation4 + $0x1], 0 }
   0x3   :  { %17 = vsyncpa [#allocation7], 0 }
   0x4   :  { %19 = vsyncpa [#allocation7 + $0x1], 0  ;;  %s1439_s24 = smov 0   ;;  %s1441_s25 = smov 0  }
   0x5   :  { %s1443_s26 = smov 0   ;;  %s1445_s27 = smov 0  }
   0x6 LB: > { %s1460_s28 = sadd.s32 4294967295, %s1387_s27   ;;  %s1037_s29 = sadd.s32 4294967294, %s1387_s27   ;;  %s1387_s27 = sphi %s1445_s27, %s1681_s27   ;;  %s1383_s26 = sphi %s1443_s26, %s1680_s26   ;;  %s1379_s25 = sphi %s1441_s25, %s1679_s25   ;;  %s1375_s24 = sphi %s1439_s24, %s1678_s24  }
   0x7   : > { %s1464_s30 = sadd.s32 1, %s1387_s27   ;;  %s173_s8 = sadd.s32 1, %s1383_s26 }
   0x8   : > { %s170_s9 = ssub.s32 %s1387_s27, %s1464_s30  ;;  %p183_p0 = scmp.ne.s32.totalorder %s1383_s26, %s1379_s25 }
   0x9   : > { %p171_p1 = scmp.eq.s32.totalorder %s170_s9, 0  ;;  %p184_p2 = scmp.eq.s32.totalorder %s1460_s28, 1 }
   0xa   : > { %p189_p3 = scmp.ne.s32.totalorder %s1379_s25, %s1375_s24  ;;  %p190_p4 = scmp.eq.s32.totalorder %s1037_s29, 1 }
   0xb   : > { %s1475_s10 = scalar_select %p171_p1, %s1383_s26, %s173_s8  }
   0xc   : > { %p1477_p5 = por %p184_p2, %p183_p0  ;;  %p1481_p6 = por %p190_p4, %p189_p3 }
   0xd   : > { %p1038_p7 = scmp.ge.s32.totalorder %s1387_s27, 1  ;;  %p223_p8 = scmp.lt.s32.totalorder %s1387_s27, 3 }
   0xe   : > { %s1669_s11 = scalar_select %p1477_p5, 1, 0 }
   0xf   : > { %s1670_s12 = scalar_select %p1481_p6, 1, 0 }
  0x10   : > { %p1666_p9 = scmp.eq.s32.totalorder %s1460_s28, 0  ;;  %p1488_p10 = pnand %p1038_p7, %p223_p8 }
  0x11   : > { %s1389_s14 = smov [#allocation2]   ;;  %s1261_s19 = scalar_lea.hbm %s1662_s4, 2048 }
  0x12   : > { %s1671_s13 = scalar_select %p1488_p10, 1, 0 }
  0x13   : > { %s238_s15 = sshll.u32 %s1389_s14, 4  ;;  %p1195_p11 = pneg %p1488_p10  ;;  %s239_s15 = int_to_ptr.vmem [resolvable:$true] %s238_s15 }
  0x14   : > { %p1262_p13 = scmp.ne.s32.totalorder %s1662_s4, %s1261_s19  ;;  %p1268_p3 = scmp.lt.u32.totalorder %s1261_s19, %s1662_s4 }
  0x15   : > { %p1496_p12 = pnand %p1666_p9, %p1195_p11 }
  0x17   : > { %p1263_p0 = pneg %p1496_p12 }
  0x19   : > { %p1264_p1 = pnand %p1263_p0, %p1262_p13 }
  0x1b   : > { %p1265_p2 = pneg %p1264_p1 }
  0x1d   : > { %p1270_p4 = pnand %p1268_p3, %p1265_p2 }
  0x1f   : > { %1273 = shalt.err (!%p1270_p4)
}
  0x20   : > { %s1274_s29 = scalar_lea.vmem %s239_s15, 2048  ;;  %p1282_p9 = scmp.lt.s32.totalorder %s239_s15, %s239_s15 }
  0x21   : > { %p1275_p7 = scmp.ne.s32.totalorder %s239_s15, %s1274_s29  ;;  %p1283_p6 = scmp.lt.s32.totalorder %s1274_s29, %s1274_s29 }
  0x23   : > { %p1277_p8 = pnand %p1275_p7, %p1263_p0  ;;  %p1284_p5 = por %p1283_p6, %p1282_p9 }
  0x25   : > { %p1278_p11 = pneg %p1277_p8 }
  0x27   : > { %p1285_p10 = pnand %p1284_p5, %p1278_p11 }
  0x29   : > { %1288 = shalt.err (!%p1285_p10)
}
  0x2a   : > { %s1390_s8 = smov 128   ;;  %s1391_s9 = smov 8  }
  0x2b   : > { %1198 = dma.hbm_to_vmem [thread:$0]  (!%p1496_p12), %s1662_s4, 2048, %s239_s15, [#allocation3], %s1390_s8, %s1390_s8, %s1391_s9  }
  0x2c   : > { %p1673_p13 = scmp.ne.s32.totalorder %s1671_s13, 0 }
  0x2d   : > { %p1674_p1 = scmp.eq.s32.totalorder (!%p1673_p13), %s1460_s28, 0 }
  0x2e   : > { %280 = sbr.rel (%p1673_p13) target bundleno = 2008 (0x7d8), region = 44 }
  0x35   : > { %1362 = dma.done.wait (%p1674_p1), [#allocation3], 2048   ;;  %p1675_p0 = pmov %p1674_p1 }
  0x36   : > { %p326_p5 = scmp.lt.s32.totalorder %s1460_s28, 1  ;;  %v1392_v0 = vmov 0.0   ;;  %v352_v1 = vld [vmem:[%s1661_s3 + $0x8] sm:$0xff]  ;;  %v351_v2 = vld [vmem:[%s1661_s3] sm:$0xff]  ;;  %vm370_vm0 = vcmask 64512   ;;  %v1393_v5 = vmov 0.0|0.0   ;;  %v525_v14 = vlaneseq }
  0x37   : > { %1364 = vsyncadd (%p1675_p0), [#allocation3], 4294965248  ;;  %441 = vmatprep.mubr.f32.mxu0 %v1392_v0  ;;  %377 = vmatprep.subr.mxu0 %v352_v1  ;;  %vm1394_vm1 = vmmov 0   ;;  %v369_v12 = vld [vmem:[%s1663_s5] sm:$0x1]  ;;  %vm531_vm3 = vcmask 130048  }
  0x38   : > { %s1524_s18 = scalar_select %p326_p5, %s1460_s28, 1  ;;  %378 = vmatpush1.msra.mxu0 %v351_v2  ;;  %1163 = vmatprep.subr.bf16.mxu1 %v1393_v5  ;;  %v454_v13 = vmul.f32 0.17677669, %v369_v12  ;;  %v526_v17 = vshrl.u32 %v525_v14, 7  ;;  %v353_v30 = vld [vmem:[#allocation2] sm:$0xff]  ;;  %v354_v31 = vld [vmem:[#allocation2 + $0x8] sm:$0xff] }
  0x39   : > { %1157 = vmatprep.subr.bf16.mxu0 %v1393_v5  ;;  %1144 = vmatprep.mubr.msk.f32.mxu1 %vm1394_vm1, %v1392_v0  ;;  %v355_v32 = vld [vmem:[#allocation2 + $0x10] sm:$0xff]  ;;  %v1164_v33 = vpack.c.bf16 %v354_v31, %v353_v30  ;;  %v356_v34 = vld [vmem:[#allocation2 + $0x18] sm:$0xff]  ;;  %v357_v36 = vld [vmem:[#allocation2 + $0x20] sm:$0xff]  ;;  %s1566_s19 = sand.u32 1, %s1379_s25   ;;  %p1676_p9 = scmp.ne.s32.totalorder %s1669_s11, 0 }
  0x3a   : > { %s1062_s16 = sshll.u32 %s1524_s18, 4  ;;  %s1047_s9 = sshll.u32 %s1524_s18, 1  ;;  %v527_v19 = vsub.s32 0, %v526_v17  ;;  %v1167_v35 = vpack.c.bf16 %v356_v34, %v355_v32  ;;  %v358_v37 = vld [vmem:[#allocation2 + $0x28] sm:$0xff]  ;;  %v359_v39 = vld [vmem:[#allocation2 + $0x30] sm:$0xff]  ;;  %v360_v40 = vld [vmem:[#allocation2 + $0x38] sm:$0xff] }
  0x3b   : > { %s330_s13 = scalar_lea.vmem %s1658_s0, %s1062_s16  ;;  %s334_s16 = scalar_lea.vmem %s1659_s1, %s1047_s9  ;;  %1165 = vmatpush3.bf16.msra.mxu1 %v1164_v33  ;;  %v1170_v38 = vpack.c.bf16 %v358_v37, %v357_v36  ;;  %v1173_v41 = vpack.c.bf16 %v360_v40, %v359_v39  ;;  %v361_v42 = vld [vmem:[#allocation2 + $0x40] sm:$0xff]  ;;  %v362_v43 = vld [vmem:[#allocation2 + $0x48] sm:$0xff]  ;;  %v363_v45 = vld [vmem:[#allocation2 + $0x50] sm:$0xff] }
  0x3c   : > { %v340_v3 = vld [vmem:[%s330_s13] sm:$0xff]  ;;  %v341_v4 = vld [vmem:[%s330_s13 + $0x8] sm:$0xff]  ;;  %1166 = vmatprep.subr.bf16.mxu1 %v1393_v5  ;;  %v1176_v44 = vpack.c.bf16 %v362_v43, %v361_v42  ;;  %v364_v46 = vld [vmem:[#allocation2 + $0x58] sm:$0xff]  ;;  %s1044_s15 = sshll.u32 %s1566_s19, 3  ;;  %s1063_s20 = sshll.u32 %s1524_s18, 2 }
  0x3d   : > { %1050 = vmatmul.mubr.msk.f32.vlgmr.msra.gmra.mrb[0].mxu0 %vm370_vm0, %v340_v3  ;;  %v342_v15 = vld [vmem:[%s334_s16] sm:$0x3]  ;;  %v1179_v47 = vpack.c.bf16 %v364_v46, %v363_v45  ;;  %v366_v49 = vld [vmem:[#allocation2 + $0x68] sm:$0xff]  ;;  %v367_v51 = vld [vmem:[#allocation2 + $0x70] sm:$0xff]  ;;  %s1569_s13 = scalar_lea.vmem [#allocation6], %s1044_s15  ;;  %s339_s23 = scalar_lea.vmem %s1660_s2, %s1063_s20 }
  0x3e   : > { %447 = vmatprep.mubr.f32.mxu0 %v1392_v0  ;;  %v343_v16 = vunpack.c.0.s8 %v342_v15  ;;  %v365_v48 = vld [vmem:[#allocation2 + $0x60] sm:$0xff]  ;;  %v368_v52 = vld [vmem:[#allocation2 + $0x78] sm:$0xff]  ;;  %s1059_s18 = sshll.u32 %s1460_s28, 7  ;;  %s910_s29 = sshll.u32 %s1569_s13, 4  ;;  %s911_s29 = int_to_ptr.vmem [resolvable:$true] %s910_s29 }
  0x3f   : > { %1168 = vmatpush3.bf16.msra.mxu1 %v1167_v35  ;;  %v1182_v50 = vpack.c.bf16 %v366_v49, %v365_v48  ;;  %v1185_v53 = vpack.c.bf16 %v368_v52, %v367_v51  ;;  %v1066_v63 = vld [vmem:[%s339_s23] sm:$0xf]   ;;  %s1588_s14 = scalar_lea.hbm %s1665_s7, %s1059_s18  ;;  %s881_s17 = scalar_lea.sflag [#allocation7], %s1566_s19 }
  0x40   : > { %v344_v18 = vcvt.s32.f32 %v343_v16  ;;  %1169 = vmatprep.subr.bf16.mxu1 %v1393_v5  ;;  %v1068_v1 = vunpack.c.1.s8 %v1066_v63  ;;  %s1289_s16 = scalar_lea.vmem %s911_s29, 128  ;;  %s1395_s15 = smov [#allocation6]  }
  0x41   : > { %1051 = vmatmul.mubr.msk.f32.gmra.mrb[2].mxu0 %vm370_vm0, %v341_v4  ;;  %p1290_p6 = scmp.ne.s32.totalorder %s911_s29, %s1289_s16  ;;  %s1293_s20 = sshll.u32 %s1395_s15, 4  ;;  %s1294_s20 = int_to_ptr.vmem [resolvable:$false] %s1293_s20 }
  0x42   : > { %1102 = vmatprep.mubr.msk.f32.mxu0 %vm1394_vm1, %v1392_v0  ;;  %vm529_vm2 = vcmp.eq.f32.partialorder %v344_v18, 0.0  ;;  %v350_v3 = vcvt.s32.f32 %v1068_v1  ;;  %s1295_s21 = scalar_lea.vmem %s1294_s20, 256  ;;  %p1296_p2 = scmp.lt.s32.totalorder %s911_s29, %s1294_s20 }
  0x43   : > { %1171 = vmatpush3.bf16.msra.mxu1 %v1170_v38  ;;  %p1291_p10 = pnand %p1290_p6, %p1676_p9  ;;  %p1297_p3 = scmp.lt.s32.totalorder %s1295_s21, %s1289_s16 }
  0x44   : > { %1172 = vmatprep.subr.bf16.mxu1 %v1393_v5  ;;  %vm763_vm5 = vcmp.eq.f32.partialorder %v350_v3, 0.0 }
  0x45   : > { %p1292_p12 = pneg %p1291_p10  ;;  %p1298_p4 = por %p1297_p3, %p1296_p2 }
  0x47   : > { %1174 = vmatpush3.bf16.msra.mxu1 %v1173_v41  ;;  %p1299_p7 = pnand %p1298_p4, %p1292_p12 }
  0x48   : > { %1175 = vmatprep.subr.bf16.mxu1 %v1393_v5 }
  0x4b   : > { %1177 = vmatpush3.bf16.msra.mxu1 %v1176_v44 }
  0x4c   : > { %1178 = vmatprep.subr.bf16.mxu1 %v1393_v5 }
  0x4f   : > { %1180 = vmatpush3.bf16.msra.mxu1 %v1179_v47 }
  0x50   : > { %1181 = vmatprep.subr.bf16.mxu1 %v1393_v5 }
  0x53   : > { %1183 = vmatpush3.bf16.msra.mxu1 %v1182_v50 }
  0x54   : > { %1184 = vmatprep.subr.bf16.mxu1 %v1393_v5 }
  0x57   : > { %1186 = vmatpush3.bf16.msra.mxu1 %v1185_v53 }
 0x110   : > { %v443_v6 = vpop.f32.mrb[0].mxu0 }
 0x111   : > { %v1540_v7 = vpop.f32.mrb[1].mxu0 }
 0x114   : > { %v449_v8 = vpop.f32.mrb[2].mxu0 }
 0x115   : > { %v1161_v9 = vpack.c.bf16 %v449_v8, %v443_v6  ;;  %v1542_v10 = vpop.f32.mrb[3].mxu0 }
 0x116   : > { %v1158_v11 = vpack.c.bf16 %v1542_v10, %v1540_v7 }
 0x118   : > { %1159 = vmatpush3.bf16.xpose.msra.mxu0 %v1158_v11 }
 0x119   : > { %1160 = vmatprep.subr.bf16.mxu0 %v1393_v5 }
 0x11f   : > { %1103 = vmatmul.mubr.f32.vlgmr.msra.gmra.mrb[4].mxu0 %v454_v13 }
 0x120   : > { %1162 = vmatpush3.bf16.msra.mxu0 %v1161_v9  ;;  %1109 = vmatprep.mubr.msk.f32.mxu0 %vm1394_vm1, %v1392_v0  ;;  %v1067_v0 = vunpack.c.0.s8 %v1066_v63 }
 0x122   : > { %v349_v2 = vcvt.s32.f32 %v1067_v0 }
 0x124   : > { %vm762_vm4 = vcmp.eq.f32.partialorder %v349_v2, 0.0 }
 0x1f2   : > { %v521_v20 = vpop.f32.mrb[4].mxu0 }
 0x1f3   : > { %v528_v21 = vrot.slane %v521_v20, %v527_v19  ;;  %v1104_v22 = vpop.f32.mrb[5].mxu0 }
 0x1f5   : > { %v530_v23 = vsel %vm529_vm2, -1e+09, %v528_v21 }
 0x1f6   : > { %v532_v24 = vsel %vm531_vm3, %v530_v23, -inf }
 0x1f7   : > { %533 = vmax.xlane.f32.xlu0 %v532_v24 }
 0x284   : > { %v534_v25 = vpop.xlane.xlu0 %533 }
 0x285   : > { %v535_v26 = vsub.f32 %v530_v23, %v534_v25 }
 0x287   : > { %v536_v27 = vmul.f32 1.442695, %v535_v26 }
 0x289   : > { %1249 = vpow2.f32 %v536_v27 }
 0x293   : > { %v1250_v28 = vpop.eup %1249 }
 0x294   : > { %v538_v29 = vsel %vm531_vm3, %v1250_v28, 0.0 }
 0x295   : > { %539 = vadd.xlane.f32.xlu0 %v538_v29 }
 0x322   : > { %v540_v54 = vpop.xlane.xlu0 %539 }
 0x323   : > { %1251 = vrcp.f32 %v540_v54 }
 0x32d   : > { %v1252_v55 = vpop.eup %1251 }
 0x32e   : > { %v542_v56 = vmul.f32 %v1252_v55, %v1250_v28 }
 0x330   : > { %1110 = vmatmul.mubr.msk.f32.vlgmr.msra.gmra.mrb[6].mxu0 %vm531_vm3, %v542_v56 }
 0x331   : > { %1149 = vmatprep.mubr.f32.mxu0 %v1540_v7 }
 0x403   : > { %v612_v57 = vpop.f32.mrb[6].mxu0 }
 0x404   : > { %v873_v58 = vmax.f32 %v612_v57, 0.0  ;;  %v1111_v59 = vpop.f32.mrb[7].mxu0  ;;  %1145 = vmatmul.mubr.f32.vlgmr.msra.gmra.mrb[0].mxu1 %v612_v57 }
 0x406   : > { %874 = vst [vmem:[%s1569_s13] sm:$0xff] %v873_v58 }
 0x4d7   : > { %v682_v60 = vpop.f32.mrb[0].mxu1 }
 0x4d8   : > { %v686_v61 = vmul.f32 0.17677669, %v682_v60  ;;  %v1146_v62 = vpop.f32.mrb[1].mxu1 }
 0x4da   : > { %1147 = vmatprep.subr.mxu0 %v686_v61 }
 0x4db   : > { %1148 = vmatpush3.xpose.msra.mxu0 %v686_v61 }
 0x4dc   : > { %1152 = vmatprep.subr.mxu0 %v612_v57 }
 0x4de   : > { %1150 = vmatmul.mubr.f32.vlgmr.msra.gmra.mrb[8].mxu0 %v1542_v10 }
 0x4df   : > { %1153 = vmatpush3.msra.mxu0 %v612_v57 }
 0x5b1   : > { %v1151_v4 = vpop.f32.mrb[8].mxu0 }
 0x5b2   : > { %v753_v5 = vpop.f32.mrb[9].mxu0  ;;  %v765_v8 = vsel %vm763_vm5, -1e+09, %v1151_v4 }
 0x5b3   : > { %v764_v6 = vsel %vm762_vm4, -1e+09, %v753_v5  ;;  %v769_v9 = vsel %vm370_vm0, %v765_v8, -inf }
 0x5b4   : > { %v766_v7 = vsel %vm370_vm0, %v764_v6, -inf }
 0x5b5   : > { %767 = vmax.xlane.f32.xlu1 %v766_v7 }
 0x5b9   : > { %770 = vmax.xlane.f32.xlu1 %v769_v9 }
 0x642   : > { %v768_v10 = vpop.xlane.xlu1 %767 }
 0x643   : > { %v772_v11 = vsub.f32 %v764_v6, %v768_v10 }
 0x645   : > { %v774_v12 = vmul.f32 1.442695, %v772_v11 }
 0x646   : > { %v771_v13 = vpop.xlane.xlu1 %770 }
 0x647   : > { %1253 = vpow2.f32 %v774_v12  ;;  %v773_v14 = vsub.f32 %v765_v8, %v771_v13 }
 0x649   : > { %v776_v15 = vmul.f32 1.442695, %v773_v14 }
 0x64b   : > { %1255 = vpow2.f32 %v776_v15 }
 0x651   : > { %v1254_v16 = vpop.eup %1253 }
 0x652   : > { %v778_v17 = vsel %vm370_vm0, %v1254_v16, 0.0 }
 0x653   : > { %779 = vadd.xlane.f32.xlu0 %v778_v17 }
 0x655   : > { %v1256_v18 = vpop.eup %1255 }
 0x656   : > { %v781_v19 = vsel %vm370_vm0, %v1256_v18, 0.0 }
 0x657   : > { %782 = vadd.xlane.f32.xlu1 %v781_v19 }
 0x6e0   : > { %v780_v20 = vpop.xlane.xlu0 %779 }
 0x6e1   : > { %1257 = vrcp.f32 %v780_v20 }
 0x6e4   : > { %v783_v21 = vpop.xlane.xlu1 %782 }
 0x6e5   : > { %1259 = vrcp.f32 %v783_v21 }
 0x6eb   : > { %v1258_v22 = vpop.eup %1257 }
 0x6ec   : > { %v786_v23 = vmul.f32 %v1258_v22, %v1254_v16 }
 0x6ee   : > { %1154 = vmatprep.mubr.msk.f32.mxu0 %vm370_vm0, %v786_v23 }
 0x6ef   : > { %v1260_v24 = vpop.eup %1259 }
 0x6f0   : > { %v787_v25 = vmul.f32 %v1260_v24, %v1256_v18 }
 0x6f2   : > { %1155 = vmatmul.mubr.msk.f32.vlgmr.msra.gmra.mrb[10].mxu0 %vm370_vm0, %v787_v25 }
 0x6f3   : > { %1302 = shalt.err (!%p1299_p7)
}
 0x6f4   : > { %s1303_s13 = scalar_lea.hbm %s1588_s14, 128  ;;  %s1307_s18 = scalar_lea.hbm %s1665_s7, 256 }
 0x6f5   : > { %p1304_p8 = scmp.ne.s32.totalorder %s1588_s14, %s1303_s13  ;;  %p1308_p1 = scmp.lt.u32.totalorder %s1588_s14, %s1665_s7 }
 0x6f6   : > { %p1309_p0 = scmp.lt.u32.totalorder %s1307_s18, %s1303_s13  ;;  %p1311_p6 = scmp.lt.u32.totalorder %s1303_s13, %s1588_s14 }
 0x6f7   : > { %p1305_p11 = pnand %p1304_p8, %p1676_p9 }
 0x6f8   : > { %p1310_p5 = por %p1309_p0, %p1308_p1 }
 0x6f9   : > { %p1306_p13 = pneg %p1305_p11 }
 0x6fa   : > { %p1312_p10 = por %p1311_p6, %p1310_p5 }
 0x6fc   : > { %p1313_p12 = pnand %p1312_p10, %p1306_p13 }
 0x6fe   : > { %1316 = shalt.err (!%p1313_p12)
}
 0x6ff   : > { %1192 = dma.vmem_to_hbm [thread:$0]  (%p1676_p9), %s911_s29, 128, %s1588_s14, %s881_s17  }
 0x700   : > { %s1043_s16 = sshll.u32 %s1566_s19, 4  ;;  %s1064_s21 = sshll.u32 %s1460_s28, 8 }
 0x701   : > { %s318_s15 = scalar_lea.vmem [#allocation5], %s1043_s16  ;;  %s1615_s23 = scalar_lea.hbm %s1664_s6, %s1064_s21 }
 0x702   : > { %s894_s20 = sshll.u32 %s318_s15, 4  ;;  %s876_s29 = scalar_lea.sflag [#allocation4], %s1566_s19  ;;  %s1610_s20 = int_to_ptr.vmem [resolvable:$true] %s894_s20 }
 0x703   : > { %s1317_s14 = scalar_lea.vmem %s1610_s20, 256  ;;  %s1396_s28 = smov [#allocation5]  }
 0x704   : > { %p1318_p2 = scmp.ne.s32.totalorder %s1610_s20, %s1317_s14  ;;  %s1321_s17 = sshll.u32 %s1396_s28, 4  ;;  %s1322_s17 = int_to_ptr.vmem [resolvable:$false] %s1321_s17 }
 0x705   : > { %s1323_s18 = scalar_lea.vmem %s1322_s17, 512  ;;  %p1324_p7 = scmp.lt.s32.totalorder %s1610_s20, %s1322_s17 }
 0x706   : > { %p1319_p3 = pnand %p1318_p2, %p1676_p9  ;;  %p1325_p8 = scmp.lt.s32.totalorder %s1323_s18, %s1317_s14 }
 0x708   : > { %p1320_p4 = pneg %p1319_p3  ;;  %p1326_p11 = por %p1325_p8, %p1324_p7 }
 0x70a   : > { %p1327_p13 = pnand %p1326_p11, %p1320_p4 }
 0x7c5   : > { %v1156_v26 = vpop.f32.mrb[10].mxu0 }
 0x7c6   : > { %v870_v27 = vmax.f32 %v1156_v26, 0.0  ;;  %v860_v28 = vpop.f32.mrb[11].mxu0 }
 0x7c7   : > { %v869_v29 = vmax.f32 %v860_v28, 0.0 }
 0x7c8   : > { %872 = vst [vmem:[%s318_s15 + $0x8] sm:$0xff] %v870_v27 }
 0x7c9   : > { %871 = vst [vmem:[%s318_s15] sm:$0xff] %v869_v29 }
 0x7ca   : > { %1330 = shalt.err (!%p1327_p13)
}
 0x7cb   : > { %s1331_s8 = scalar_lea.hbm %s1615_s23, 256  ;;  %s1335_s15 = scalar_lea.hbm %s1664_s6, 512 }
 0x7cc   : > { %p1332_p1 = scmp.ne.s32.totalorder %s1615_s23, %s1331_s8  ;;  %p1336_p6 = scmp.lt.u32.totalorder %s1615_s23, %s1664_s6 }
 0x7cd   : > { %p1337_p10 = scmp.lt.u32.totalorder %s1335_s15, %s1331_s8  ;;  %p1339_p2 = scmp.lt.u32.totalorder %s1331_s8, %s1615_s23 }
 0x7ce   : > { %p1333_p0 = pnand %p1332_p1, %p1676_p9 }
 0x7cf   : > { %p1338_p12 = por %p1337_p10, %p1336_p6 }
 0x7d0   : > { %p1334_p5 = pneg %p1333_p0 }
 0x7d1   : > { %p1340_p3 = por %p1339_p2, %p1338_p12 }
 0x7d3   : > { %p1341_p4 = pnand %p1340_p3, %p1334_p5 }
 0x7d5   : > { %1344 = shalt.err (!%p1341_p4)
}
 0x7d6   : > { %s1397_s22 = smov 128   ;;  %s1398_s14 = smov 8  }
 0x7d7   : > { %1191 = dma.vmem_to_hbm [thread:$0]  (%p1676_p9), %s1610_s20, 256, %s1615_s23, %s876_s29, %s1397_s22, %s1397_s22, %s1398_s14  }
 0x7d8 PF: > { %p1208_p7 = scmp.ge.s32.totalorder %s1387_s27, 2  ;;  %s922_s28 = sand.u32 1, %s1375_s24  }
 0x7d9   : > { %p1677_p8 = scmp.ne.s32.totalorder %s1670_s12, 0  ;;  %s923_s17 = scalar_lea.sflag [#allocation4], %s922_s28 }
 0x7db   : > { %p1200_p11 = pnand %p1208_p7, %p1677_p8 }
 0x7dd   : > { %1366 = dma.done.wait (!%p1200_p11), %s923_s17, 256  }
 0x7de   : > { %1368 = vsyncadd (!%p1200_p11), %s923_s17, 4294967040  ;;  %s932_s18 = scalar_lea.sflag [#allocation7], %s922_s28 }
 0x7df   : > { %1370 = dma.done.wait (!%p1200_p11), %s932_s18, 128  }
 0x7e0   : > { %1372 = vsyncadd (!%p1200_p11), %s932_s18, 4294967168  ;;  %p22_p9 = scmp.ge.s32.totalorder %s1464_s30, 4   ;;  %s1678_s24 = smov %s1379_s25 }
 0x7e1   : > { %s1679_s25 = smov %s1383_s26  ;;  %s1680_s26 = smov %s1475_s10 }
 0x7e2   : > { %s1681_s27 = smov %s1464_s30  ;;  %24 = sbr.rel (!%p22_p9) target bundleno = 6 (0x6), region = 107 }
 0x7e9   :  { %937 = vsyncpa [#allocation3], 1 }
 0x7ea   :  { %939 = vsyncpa [#allocation3 + $0x1], 1 }
 0x7eb   :  { %940 = vsyncpa [#allocation4], 1 }
 0x7ec   :  { %942 = vsyncpa [#allocation4 + $0x1], 1 }
 0x7ed   :  { %943 = vsyncpa [#allocation7], 1 }
 0x7ee   :  { %945 = vsyncpa [#allocation7 + $0x1], 1 }

</bundles_post_ra>
